<compile_context>
chip_gen: v5e
topology: v5e:2x2
jax: 0.10.0
libtpu: 0.0.40
codegen_flags: <defaults>
</compile_context>

<pallas_src>
import jax
import jax.numpy as jnp
from jax.experimental import pallas as pl
from jax.experimental.pallas import tpu as pltpu


def _round_up(x: int, m: int) -> int:
    return (x + m - 1) // m * m


def _choose_batch_tiling(B: int):
    """Pick (tb, B_pad): multiple-of-8 batch tile minimizing padding, preferring
    >= 2 blocks (v7x megacore) and larger tiles among ties."""
    B8 = _round_up(B, 8)
    if B8 <= 8:
        return 8, 8
    best_tb, best_key = 8, None
    for tb in range(8, min(256, B8) + 1, 8):
        B_pad = _round_up(B, tb)
        nb = B_pad // tb
        key = (B_pad - B, 0 if nb >= 2 else 1, -tb)
        if best_key is None or key < best_key:
            best_key, best_tb = key, tb
    return best_tb, _round_up(B, best_tb)


# ---------------------------------------------------------------------------
# Plan A: whole transposed weight is VMEM-resident; grid = (nb,)
# ---------------------------------------------------------------------------
def _linear_kernel_resident(x_ref, wt_ref, b_ref, o_ref):
    # x_ref : (tb, IN)       batch tile of activations
    # wt_ref: (IN, OUT_pad)  full transposed weight (constant block index -> one DMA)
    # b_ref : (1, OUT_pad)   f32 bias row (resident)
    # o_ref : (tb, OUT_pad)  f32 output tile
    x = x_ref[...].astype(wt_ref.dtype)   # no-op for f32; bf16 cast for MXU path
    o_ref[...] = (
        jnp.dot(x, wt_ref[...], preferred_element_type=jnp.float32) + b_ref[...]
    )


# ---------------------------------------------------------------------------
# Plan B: tile OUT (N) and IN (K); grid = (nb, nn, nk), K innermost.
# The f32 output block is resident across K and doubles as the accumulator.
# ---------------------------------------------------------------------------
def _linear_kernel_tiled(x_ref, wt_ref, b_ref, o_ref):
    k = pl.program_id(2)
    x = x_ref[...].astype(wt_ref.dtype)
    partial = jnp.dot(x, wt_ref[...], preferred_element_type=jnp.float32)

    @pl.when(k == 0)
    def _():
        o_ref[...] = partial + b_ref[...]   # write (no zero-init + add pass)

    @pl.when(k != 0)
    def _():
        o_ref[...] += partial


def regression_model_forward(x, weight, bias, *, compute_dtype=None,
                             force_tiled=False):
    """y = x @ weight.T + bias  (matches torch.nn.Linear forward).

    compute_dtype: dtype fed to the MXU (e.g. jnp.bfloat16). Accumulation is
    always f32; the result is returned in x.dtype.
    """
    B, IN = x.shape
    OUT, IN2 = weight.shape
    assert IN == IN2 and bias.shape == (OUT,)
    if compute_dtype is None:
        compute_dtype = x.dtype
    w_isz = jnp.dtype(compute_dtype).itemsize
    x_isz = jnp.dtype(x.dtype).itemsize

    OUT_pad = _round_up(OUT, 128)            # lane-dense output -> unmasked vst
    tb, B_pad = _choose_batch_tiling(B)
    nb = B_pad // tb

    # One-time host transpose + pad of the (small) weight / bias; the kernel then
    # runs a plain NN contraction with no in-kernel transpose.
    wt_p = jnp.pad(weight.T, ((0, 0), (0, OUT_pad - OUT))).astype(compute_dtype)
    b_p = jnp.pad(bias, (0, OUT_pad - OUT)).reshape(1, OUT_pad).astype(jnp.float32)

    # Estimated VMEM for the resident-W plan (pipeliner allocates 2 buffers each).
    resident_bytes = (2 * tb * IN * x_isz          # x tile (double buffered)
                      + 2 * IN * OUT_pad * w_isz   # W (constant index map)
                      + 2 * OUT_pad * 4            # bias
                      + 2 * tb * OUT_pad * 4)      # f32 output tile
    use_resident = (not force_tiled) and resident_bytes <= 32 * 1024 * 1024

    if use_resident:
        # ---- plan A --------------------------------------------------------
        x_p = x if B_pad == B else jnp.pad(x, ((0, B_pad - B), (0, 0)))
        grid = (nb,)
        in_specs = [
            pl.BlockSpec((tb, IN), lambda i: (i, 0)),        # x batch tile
            pl.BlockSpec((IN, OUT_pad), lambda i: (0, 0)),   # W: fetched once
            pl.BlockSpec((1, OUT_pad), lambda i: (0, 0)),    # bias: resident
        ]
        out_specs = pl.BlockSpec((tb, OUT_pad), lambda i: (i, 0))
        kernel = _linear_kernel_resident
        dim_sem = ("parallel",)
        flops = 2 * B_pad * IN * OUT_pad
        bytes_accessed = (B_pad * IN * x_isz + IN * OUT_pad * w_isz
                          + OUT_pad * 4 + B_pad * OUT_pad * 4)
        vmem_est = resident_bytes
    else:
        # ---- plan B --------------------------------------------------------
        IN_pad = _round_up(IN, 128)
        tk = 512 if IN_pad % 512 == 0 else (256 if IN_pad % 256 == 0 else 128)
        tn = 512 if OUT_pad % 512 == 0 else (256 if OUT_pad % 256 == 0 else 128)
        tk, tn = min(tk, IN_pad), min(tn, OUT_pad)
        nk, nn = IN_pad // tk, OUT_pad // tn
        # TODO(synk): a BoundedSlice last-K block would avoid materializing this pad
        # of x when IN is not 128-aligned (no-op for typical aligned hidden sizes).
        x_p = x if (B_pad == B and IN_pad == IN) else jnp.pad(
            x, ((0, B_pad - B), (0, IN_pad - IN)))
        wt_p = wt_p if IN_pad == IN else jnp.pad(wt_p, ((0, IN_pad - IN), (0, 0)))
        grid = (nb, nn, nk)
        in_specs = [
            pl.BlockSpec((tb, tk), lambda i, j, k: (i, k)),   # x
            pl.BlockSpec((tk, tn), lambda i, j, k: (k, j)),   # W tile
            pl.BlockSpec((1, tn), lambda i, j, k: (0, j)),    # bias tile
        ]
        out_specs = pl.BlockSpec((tb, tn), lambda i, j, k: (i, j))
        kernel = _linear_kernel_tiled
        dim_sem = ("parallel", "parallel", "arbitrary")
        flops = 2 * B_pad * IN_pad * OUT_pad
        bytes_accessed = (B_pad * IN_pad * x_isz * nn        # x re-read per N tile
                          + IN_pad * OUT_pad * w_isz * nb    # W re-read per batch tile
                          + OUT_pad * 4 + B_pad * OUT_pad * 4)
        vmem_est = 2 * (tb * tk * x_isz + tk * tn * w_isz + tn * 4 + tb * tn * 4)

    # Explicit VMEM budget derived from the block plan (safe on v7x's 64 MiB).
    vmem_limit = int(min(64 * 1024 * 1024, max(32 * 1024 * 1024, 2 * vmem_est)))

    cost = pl.CostEstimate(flops=int(flops), transcendentals=0,
                           bytes_accessed=int(bytes_accessed))

    y_pad = pl.pallas_call(
        kernel,
        out_shape=jax.ShapeDtypeStruct((B_pad, OUT_pad), jnp.float32),
        grid_spec=pltpu.PrefetchScalarGridSpec(
            num_scalar_prefetch=0,
            grid=grid,
            in_specs=in_specs,
            out_specs=out_specs,
        ),
        compiler_params=pltpu.CompilerParams(
            dimension_semantics=dim_sem,
            vmem_limit_bytes=vmem_limit,
        ),
        cost_estimate=cost,
    )(x_p, wt_p, b_p)

    y = y_pad if (B_pad == B and OUT_pad == OUT) else y_pad[:B, :OUT]
    return y if y.dtype == x.dtype else y.astype(x.dtype)


if __name__ == "__main__":
    key = jax.random.PRNGKey(0)
    k_x, k_w, k_b = jax.random.split(key, 3)

    batch, input_size, output_size = 8, 32, 16
    x = jax.random.normal(k_x, (batch, input_size), dtype=jnp.float32)
    weight = jax.random.normal(k_w, (output_size, input_size), dtype=jnp.float32) * 0.1
    bias = jax.random.normal(k_b, (output_size,), dtype=jnp.float32) * 0.1
    y_ref = x @ weight.T + bias

    # Plan A (resident W), f32 compute: exact match.
    y = jax.block_until_ready(regression_model_forward(x, weight, bias))
    assert y.shape == (batch, output_size)
    assert jnp.allclose(y, y_ref, atol=1e-5, rtol=1e-5)

    # Plan A, bf16 MXU compute (f32 accumulate): looser tolerance.
    y_bf = jax.block_until_ready(
        regression_model_forward(x, weight, bias, compute_dtype=jnp.bfloat16))
    assert jnp.allclose(y_bf, y_ref, atol=3e-2, rtol=3e-2)

    # Plan B (tiled N/K grid with output-ref accumulation), exercised explicitly.
    B2, IN2, OUT2 = 24, 640, 384
    x2 = jax.random.normal(k_x, (B2, IN2), dtype=jnp.float32)
    w2 = jax.random.normal(k_w, (OUT2, IN2), dtype=jnp.float32) * 0.05
    b2 = jax.random.normal(k_b, (OUT2,), dtype=jnp.float32) * 0.1
    y2 = jax.block_until_ready(
        regression_model_forward(x2, w2, b2, force_tiled=True))
    y2_ref = x2 @ w2.T + b2
    assert y2.shape == (B2, OUT2)
    assert jnp.allclose(y2, y2_ref, atol=2e-2, rtol=2e-2)

    print("KERNEL_OK")
</pallas_src>

<mosaic_0001>
module attributes {stable_mosaic.version = 11 : i64} {
  func.func @_linear_kernel_resident(%arg0: i32, %arg1: memref<8x32xf32, #tpu.memory_space<vmem>>, %arg2: memref<32x128xf32, #tpu.memory_space<vmem>>, %arg3: memref<1x128xf32, #tpu.memory_space<vmem>>, %arg4: memref<8x128xf32, #tpu.memory_space<vmem>>) attributes {dimension_semantics = [#tpu.dimension_semantics<parallel>], iteration_bounds = array<i64: 1>, scalar_prefetch = 0 : i64, scratch_operands = 0 : i64, tpu.core_type = #tpu.core_type<tc>, window_params = [{transform_indices = @transform_0, window_bounds = array<i64: 8, 32>}, {pipeline_mode = #tpu.pipeline_mode<synchronous>, transform_indices = @transform_1, window_bounds = array<i64: 32, 128>}, {pipeline_mode = #tpu.pipeline_mode<synchronous>, transform_indices = @transform_2, window_bounds = array<i64: 1, 128>}, {transform_indices = @transform_3, window_bounds = array<i64: 8, 128>}]} {
    %c0 = arith.constant 0 : index
    %c0_0 = arith.constant 0 : index
    %0 = vector.load %arg1[%c0, %c0_0] : memref<8x32xf32, #tpu.memory_space<vmem>>, vector<8x32xf32>
    %c0_1 = arith.constant 0 : index
    %c0_2 = arith.constant 0 : index
    %1 = vector.load %arg2[%c0_1, %c0_2] : memref<32x128xf32, #tpu.memory_space<vmem>>, vector<32x128xf32>
    %cst = arith.constant dense<0.000000e+00> : vector<8x128xf32>
    %2 = tpu.matmul %0, %1, %cst {dimension_numbers = #tpu.dot_dimension_numbers<[1], [0], [0], [1], [0, 0, 1, 1], [], []>} : vector<8x32xf32>, vector<32x128xf32>, vector<8x128xf32> -> vector<8x128xf32>
    %c0_3 = arith.constant 0 : index
    %c0_4 = arith.constant 0 : index
    %3 = vector.load %arg3[%c0_3, %c0_4] : memref<1x128xf32, #tpu.memory_space<vmem>>, vector<1x128xf32>
    %4 = vector.broadcast %3 : vector<1x128xf32> to vector<8x128xf32>
    %5 = arith.addf %2, %4 : vector<8x128xf32>
    %c0_5 = arith.constant 0 : index
    %c0_6 = arith.constant 0 : index
    %6 = vector.load %arg4[%c0_5, %c0_6] : memref<8x128xf32, #tpu.memory_space<vmem>>, vector<8x128xf32>
    tpu.vector_store %arg4[%c0_5, %c0_6], %5 {strides = array<i32>} : memref<8x128xf32, #tpu.memory_space<vmem>>, vector<8x128xf32>,
    return
  }
  func.func @transform_0(%arg0: i32) -> (i32, i32) {
    %c0_i32 = arith.constant 0 : i32
    %c0_i32_0 = arith.constant 0 : i32
    return %arg0, %c0_i32 : i32, i32
  }
  func.func @transform_1(%arg0: i32) -> (i32, i32) {
    %c0_i32 = arith.constant 0 : i32
    %c0_i32_0 = arith.constant 0 : i32
    %c0_i32_1 = arith.constant 0 : i32
    return %c0_i32, %c0_i32_0 : i32, i32
  }
  func.func @transform_2(%arg0: i32) -> (i32, i32) {
    %c0_i32 = arith.constant 0 : i32
    %c0_i32_0 = arith.constant 0 : i32
    %c0_i32_1 = arith.constant 0 : i32
    return %c0_i32, %c0_i32_0 : i32, i32
  }
  func.func @transform_3(%arg0: i32) -> (i32, i32) {
    %c0_i32 = arith.constant 0 : i32
    %c0_i32_0 = arith.constant 0 : i32
    return %arg0, %c0_i32 : i32, i32
  }
}

</mosaic_0001>

<bundles_post_ra>
// kernel: tpu_custom_call.1
= control target key start
LH: loop header
LB: loop body
LE: loop exit
PB: predicated region body
PF: predicated region fallthrough
CT: control target
= control target key end

     0   :  { %8 = vsyncpa [#allocation3], 0  ;;  %s219_s0 = inlined_call_operand.hbm [shape: f32[8,32], index: 0, kind: input, shape index: {}]   ;;  %s220_s1 = inlined_call_operand.hbm [shape: f32[32,128], index: 1, kind: input, shape index: {}]   ;;  %s221_s2 = inlined_call_operand.vmem [shape: f32[1,128], index: 2, kind: input, shape index: {}]   ;;  %s222_s3 = inlined_call_operand.hbm [shape: f32[8,128], index: 3, kind: output, shape index: {}]  }
   0x1   :  { %9 = vsyncpa [#allocation6], 0 }
   0x2   :  { %10 = vsyncpa [#allocation4], 0  ;;  %s16_s14 = sshll.u32 %s219_s0, 4  ;;  %s182_s15 = smov [#allocation2]   ;;  %s17_s14 = int_to_ptr.hbm [resolvable:$true] %s16_s14 }
   0x3   :  { %s18_s16 = sshll.u32 %s182_s15, 4  ;;  %s26_s19 = sshll.u32 %s220_s1, 4  ;;  %s19_s16 = int_to_ptr.vmem [resolvable:$true] %s18_s16  ;;  %s27_s19 = int_to_ptr.hbm [resolvable:$true] %s26_s19 }
   0x4   :  { %21 = dma.hbm_to_vmem [thread:$0]  %s17_s14, 128, %s19_s16, [#allocation3]  }
   0x5   :  { %s183_s20 = smov [#allocation5]   ;;  %s184_s22 = smov 128  }
   0x6   :  { %s28_s21 = sshll.u32 %s183_s20, 4  ;;  %s185_s23 = smov 8   ;;  %s29_s21 = int_to_ptr.vmem [resolvable:$true] %s28_s21 }
   0x7   :  { %34 = dma.hbm_to_vmem [thread:$0]  %s27_s19, 512, %s29_s21, [#allocation6], %s184_s22, %s184_s22, %s185_s23  }
   0x8   :  { %176 = dma.done.wait [#allocation3], 128  }
   0x9   :  { %177 = vsyncadd [#allocation3], 4294967168 }
   0xa   :  { %178 = dma.done.wait [#allocation6], 512  }
   0xb   :  { %179 = vsyncadd [#allocation6], 4294966784  ;;  %v49_v0 = vld [vmem:[#allocation5 + $0x18] sm:$0xff]  ;;  %v48_v1 = vld [vmem:[#allocation5 + $0x10] sm:$0xff]  ;;  %vm54_vm0 = vcmask 261120   ;;  %s186_s24 = smov [#allocation7]  }
   0xc   :  { %70 = vmatpush.msra.mxu0 %v49_v0  ;;  %v47_v2 = vld [vmem:[#allocation5 + $0x8] sm:$0xff]  ;;  %v46_v3 = vld [vmem:[#allocation5] sm:$0xff]  ;;  %v45_v4 = vld [vmem:[#allocation2] sm:$0xff]  ;;  %s84_s25 = sshll.u32 %s186_s24, 4  ;;  %s86_s28 = sshll.u32 %s222_s3, 4  ;;  %s85_s25 = int_to_ptr.vmem [resolvable:$true] %s84_s25  ;;  %s87_s28 = int_to_ptr.hbm [resolvable:$true] %s86_s28 }
   0xd   :  { %v103_v5 = vld [vmem:[%s221_s2] ss:$0 sm:$0xff] }
   0xe   :  { %71 = vmatpush.msra.mxu0 %v48_v1 }
  0x10   :  { %72 = vmatpush.msra.mxu0 %v47_v2 }
  0x12   :  { %73 = vmatpush.msra.mxu0 %v46_v3 }
  0x13   :  { %97 = vmatmul.msk.f32.vlgmr.msra.gmra.mxu0 %vm54_vm0, %v45_v4 }
  0x90   :  { %v75_v6 = vpop.f32.mrf.mxu0 }
  0x91   :  { %v76_v7 = vadd.f32 %v103_v5, %v75_v6 }
  0x93   :  { %78 = vst [vmem:[#allocation7] sm:$0xff] %v76_v7 }
  0x94   :  { %89 = dma.vmem_to_hbm [thread:$0]  %s85_s25, 128, %s87_s28, [#allocation4]  }
  0x95   :  { %180 = dma.done.wait [#allocation4], 128  }
  0x96   :  { %181 = vsyncadd [#allocation4], 4294967168 }
  0x97   :  { %94 = vsyncpa [#allocation3], 1 }
  0x98   :  { %95 = vsyncpa [#allocation6], 1 }
  0x99   :  { %96 = vsyncpa [#allocation4], 1 }

</bundles_post_ra>
